<compile_context>
chip_gen: v7x
topology: tpu7x:2x2x1
jax: 0.10.0
libtpu: 0.0.40
codegen_flags: <defaults>
</compile_context>

<pallas_src>
import functools

import jax
import jax.numpy as jnp
from jax.experimental import pallas as pl
from jax.experimental.pallas import tpu as pltpu

_LANE = 128


def _poly_kernel(coeff_ref, x_ref, o_ref, *, degree):
    """Horner evaluation of sum_i coeff[i] * x**i on one (block_rows, 128) tile."""
    x = x_ref[...]
    if degree == 0:
        o_ref[...] = jnp.full_like(x, coeff_ref[0])
        return
    # Horner: ((c_d * x + c_{d-1}) * x + ...) * x + c_0
    acc = coeff_ref[degree] * x + coeff_ref[degree - 1]
    for i in range(degree - 2, -1, -1):
        acc = acc * x + coeff_ref[i]
    o_ref[...] = acc.astype(o_ref.dtype)


def _round_up(a, b):
    return ((a + b - 1) // b) * b


def kmodel_forward(x, coeff, *, block_rows=512):
    """Polynomial evaluation matching KModel.forward.

    x:     (N,) float32
    coeff: (degree+1,) float32
    returns (N,) float32
    """
    n = x.shape[0]
    degree = coeff.shape[0] - 1

    rows = pl.cdiv(n, _LANE)
    padded = rows * _LANE
    if padded != n:
        # <=127 pad elements just so the row-major reshape is legal; the partial
        # boundary grid block is masked by Pallas (out-of-bounds stores dropped),
        # so no pre-padding to a full tile multiple is needed.
        x2 = jnp.pad(x, (0, padded - n)).reshape(rows, _LANE)
    else:
        x2 = x.reshape(rows, _LANE)  # row-major reshape: free, no copy

    # block_rows must be a multiple of 8 (sublanes); don't oversize tiny inputs.
    block_rows = max(8, min(_round_up(block_rows, 8), _round_up(rows, 8)))
    grid = (pl.cdiv(rows, block_rows),)

    out2 = pl.pallas_call(
        functools.partial(_poly_kernel, degree=degree),
        out_shape=jax.ShapeDtypeStruct((rows, _LANE), x.dtype),
        grid=grid,
        in_specs=[
            pl.BlockSpec(memory_space=pltpu.SMEM),                # coefficients (whole vector)
            pl.BlockSpec((block_rows, _LANE), lambda i: (i, 0)),  # x tile
        ],
        out_specs=pl.BlockSpec((block_rows, _LANE), lambda i: (i, 0)),
        compiler_params=pltpu.CompilerParams(
            dimension_semantics=("parallel",)  # v7x: shards grid steps across both TCs
        ),
    )(coeff, x2)

    y = out2.reshape(-1)
    return y[:n] if padded != n else y


def _reference(x, coeff):
    # Mirrors the PyTorch forward: stack powers, broadcast-multiply, sum over axis 1.
    powers = jnp.stack([x ** i for i in range(coeff.shape[0])], axis=1)  # (N, d+1)
    return jnp.sum(coeff[None, :] * powers, axis=1)


if __name__ == "__main__":
    key = jax.random.PRNGKey(0)
    degree = 3
    # Deterministic "randn(())" parameters, stacked as a (degree+1,) vector.
    coeff = jax.random.normal(key, (degree + 1,), dtype=jnp.float32)

    # Input consistent with the module's usage: x = linspace(-2, 2, N).
    n = 1000
    x = jnp.linspace(-2.0, 2.0, n, dtype=jnp.float32)

    y = jax.block_until_ready(kmodel_forward(x, coeff))
    y_ref = _reference(x, coeff)
    assert y.shape == (n,)
    assert jnp.allclose(y, y_ref, rtol=1e-5, atol=1e-5), "mismatch vs reference (n=1000)"

    # Secondary check: multiple grid steps + masked boundary block (n not a
    # multiple of 128, rows not a multiple of block_rows).
    n2 = 131136  # 1025 rows of 128 (last 64 lanes padded), grid length 3 at block_rows=512
    x2 = jnp.linspace(-2.0, 2.0, n2, dtype=jnp.float32)
    y2 = jax.block_until_ready(kmodel_forward(x2, coeff))
    y2_ref = _reference(x2, coeff)
    assert y2.shape == (n2,)
    assert jnp.allclose(y2, y2_ref, rtol=1e-5, atol=1e-5), "mismatch vs reference (n=131136)"

    print("KERNEL_OK")
</pallas_src>

<mosaic_0001>
module attributes {stable_mosaic.version = 11 : i64} {
  func.func @_poly_kernel(%arg0: i32, %arg1: memref<4xf32, #tpu.memory_space<smem>>, %arg2: memref<8x128xf32, #tpu.memory_space<vmem>>, %arg3: memref<8x128xf32, #tpu.memory_space<vmem>>) attributes {dimension_semantics = [#tpu.dimension_semantics<parallel>], iteration_bounds = array<i64: 1>, scalar_prefetch = 0 : i64, scratch_operands = 0 : i64, tpu.core_type = #tpu.core_type<tc>, window_params = [{transform_indices = @transform_0, window_bounds = array<i64: 4>}, {transform_indices = @transform_1, window_bounds = array<i64: 8, 128>}, {transform_indices = @transform_2, window_bounds = array<i64: 8, 128>}]} {
    %c0 = arith.constant 0 : index
    %c0_0 = arith.constant 0 : index
    %0 = vector.load %arg2[%c0, %c0_0] : memref<8x128xf32, #tpu.memory_space<vmem>>, vector<8x128xf32>
    %c3 = arith.constant 3 : index
    %1 = memref.load %arg1[%c3] : memref<4xf32, #tpu.memory_space<smem>>
    %2 = vector.broadcast %1 : f32 to vector<8x128xf32>
    %3 = arith.mulf %2, %0 : vector<8x128xf32>
    %c2 = arith.constant 2 : index
    %4 = memref.load %arg1[%c2] : memref<4xf32, #tpu.memory_space<smem>>
    %5 = vector.broadcast %4 : f32 to vector<8x128xf32>
    %6 = arith.addf %3, %5 : vector<8x128xf32>
    %7 = arith.mulf %6, %0 : vector<8x128xf32>
    %c1 = arith.constant 1 : index
    %8 = memref.load %arg1[%c1] : memref<4xf32, #tpu.memory_space<smem>>
    %9 = vector.broadcast %8 : f32 to vector<8x128xf32>
    %10 = arith.addf %7, %9 : vector<8x128xf32>
    %11 = arith.mulf %10, %0 : vector<8x128xf32>
    %c0_1 = arith.constant 0 : index
    %12 = memref.load %arg1[%c0_1] : memref<4xf32, #tpu.memory_space<smem>>
    %13 = vector.broadcast %12 : f32 to vector<8x128xf32>
    %14 = arith.addf %11, %13 : vector<8x128xf32>
    %c0_2 = arith.constant 0 : index
    %c0_3 = arith.constant 0 : index
    %15 = vector.load %arg3[%c0_2, %c0_3] : memref<8x128xf32, #tpu.memory_space<vmem>>, vector<8x128xf32>
    tpu.vector_store %arg3[%c0_2, %c0_3], %14 {strides = array<i32>} : memref<8x128xf32, #tpu.memory_space<vmem>>, vector<8x128xf32>,
    return
  }
  func.func @transform_0(%arg0: i32) -> i32 {
    %c0_i32 = arith.constant 0 : i32
    %c0_i32_0 = arith.constant 0 : i32
    return %c0_i32 : i32
  }
  func.func @transform_1(%arg0: i32) -> (i32, i32) {
    %c0_i32 = arith.constant 0 : i32
    %c0_i32_0 = arith.constant 0 : i32
    return %arg0, %c0_i32 : i32, i32
  }
  func.func @transform_2(%arg0: i32) -> (i32, i32) {
    %c0_i32 = arith.constant 0 : i32
    %c0_i32_0 = arith.constant 0 : i32
    return %arg0, %c0_i32 : i32, i32
  }
}

</mosaic_0001>

<bundles_post_ra>
// kernel: tpu_custom_call.1
= control target key start
LH: loop header
LB: loop body
LE: loop exit
PB: predicated region body
PF: predicated region fallthrough
CT: control target
= control target key end

     0   :  { %7 = vsyncpa [#allocation5], 0  ;;  %s187_s0 = inlined_call_operand.hbm [shape: f32[4], index: 0, kind: input, shape index: {}]   ;;  %s188_s1 = inlined_call_operand.hbm [shape: f32[8,128], index: 1, kind: input, shape index: {}]   ;;  %s189_s2 = inlined_call_operand.hbm [shape: f32[8,128], index: 2, kind: output, shape index: {}]  }
   0x1   :  { %8 = vsyncpa [#allocation3], 0 }
   0x2   :  { %9 = vsyncpa [#allocation4], 0  ;;  %s73_s11 = scalar_lea.hbm %s187_s0, 16 }
   0x3   :  { %p74_p0 = scmp.ne.s32.totalorder %s187_s0, %s73_s11  ;;  %p77_p1 = scmp.lt.u32.totalorder %s73_s11, %s187_s0 }
   0x5   :  { %p79_p2 = pnand %p77_p1, %p74_p0 }
   0x7   :  { %82 = shalt.err (!%p79_p2)
}
   0x8   :  { %s133_s16 = smov [#allocation2]   ;;  %s134_s19 = smov [#allocation6]  }
   0x9   :  { %17 = dma.hbm_to_smem %s187_s0, 16, %s133_s16, [#allocation5]  }
   0xa   :  { %s24_s20 = sshll.u32 %s134_s19, 4  ;;  %s83_s23 = scalar_lea.hbm %s188_s1, 128  ;;  %s25_s20 = int_to_ptr.vmem [resolvable:$true] %s24_s20 }
   0xb   :  { %p84_p3 = scmp.ne.s32.totalorder %s188_s1, %s83_s23  ;;  %p87_p4 = scmp.lt.u32.totalorder %s83_s23, %s188_s1 }
   0xd   :  { %p89_p5 = pnand %p87_p4, %p84_p3 }
   0xf   :  { %92 = shalt.err (!%p89_p5)
}
  0x10   :  { %s93_s28 = scalar_lea.vmem %s25_s20, 128  ;;  %p98_p7 = scmp.lt.s32.totalorder %s25_s20, %s25_s20 }
  0x11   :  { %p94_p6 = scmp.ne.s32.totalorder %s25_s20, %s93_s28  ;;  %p99_p8 = scmp.lt.s32.totalorder %s93_s28, %s93_s28 }
  0x13   :  { %p100_p9 = por %p99_p8, %p98_p7 }
  0x15   :  { %p101_p10 = pnand %p100_p9, %p94_p6 }
  0x17   :  { %104 = shalt.err (!%p101_p10)
}
  0x18   :  { %27 = dma.hbm_to_vmem [thread:$0]  %s188_s1, 128, %s25_s20, [#allocation3]  }
  0x19   :  { %127 = dma.done.wait [#allocation5], 16  }
  0x1a   :  { %128 = vsyncadd [#allocation5], 4294967280 }
  0x1b   :  { %129 = dma.done.wait [#allocation3], 128  }
  0x1c   :  { %130 = vsyncadd [#allocation3], 4294967168 }
  0x1d   :  { %34 = sfence }
  0x1e   :  { %s67_s30 = sld [smem:[#allocation2 + $0x3]]  ;;  %s68_s3 = sld [smem:[#allocation2 + $0x2]]  ;;  %v35_v0 = vld [vmem:[#allocation6] sm:$0xff] }
  0x1f   :  { %s69_s4 = sld [smem:[#allocation2 + $0x1]]  ;;  %s47_s5 = sld [smem:[#allocation2]] }
  0x20   :  { %s135_s6 = smov [#allocation7]  }
  0x21   :  { %s57_s1 = sshll.u32 %s135_s6, 4  ;;  %s58_s1 = int_to_ptr.vmem [resolvable:$true] %s57_s1 }
  0x22   :  { %s105_s7 = scalar_lea.vmem %s58_s1, 128  ;;  %p110_p12 = scmp.lt.s32.totalorder %s58_s1, %s58_s1 }
  0x23   :  { %p106_p11 = scmp.ne.s32.totalorder %s58_s1, %s105_s7  ;;  %p111_p13 = scmp.lt.s32.totalorder %s105_s7, %s105_s7 }
  0x24   :  { %v37_v1 = vstv %s67_s30  ;;  %v40_v2 = vstv %s68_s3 }
  0x25   :  { %v38_v3 = vmul.f32 %v37_v1, %v35_v0  ;;  %v44_v5 = vstv %s69_s4  ;;  %v48_v8 = vstv %s47_s5  ;;  %p112_p0 = por %p111_p13, %p110_p12 }
  0x27   :  { %v41_v4 = vadd.f32 %v40_v2, %v38_v3  ;;  %p113_p1 = pnand %p112_p0, %p106_p11 }
  0x29   :  { %v42_v6 = vmul.f32 %v41_v4, %v35_v0 }
  0x2b   :  { %v45_v7 = vadd.f32 %v44_v5, %v42_v6 }
  0x2d   :  { %v46_v9 = vmul.f32 %v45_v7, %v35_v0 }
  0x2f   :  { %v49_v10 = vadd.f32 %v48_v8, %v46_v9 }
  0x31   :  { %50 = vst [vmem:[#allocation7] sm:$0xff] %v49_v10 }
  0x32   :  { %116 = shalt.err (!%p113_p1)
}
  0x33   :  { %s117_s10 = scalar_lea.hbm %s189_s2, 128 }
  0x34   :  { %p118_p2 = scmp.ne.s32.totalorder %s189_s2, %s117_s10  ;;  %p121_p3 = scmp.lt.u32.totalorder %s117_s10, %s189_s2 }
  0x36   :  { %p123_p4 = pnand %p121_p3, %p118_p2 }
  0x38   :  { %126 = shalt.err (!%p123_p4)
}
  0x39   :  { %60 = dma.vmem_to_hbm [thread:$0]  %s58_s1, 128, %s189_s2, [#allocation4]  }
  0x3a   :  { %131 = dma.done.wait [#allocation4], 128  }
  0x3b   :  { %132 = vsyncadd [#allocation4], 4294967168 }
  0x3c   :  { %64 = vsyncpa [#allocation3], 1 }
  0x3d   :  { %65 = vsyncpa [#allocation4], 1 }
  0x3e   :  { %66 = vsyncpa [#allocation5], 1 }

</bundles_post_ra>
